<compile_context>
chip_gen: v5e
topology: v5e:2x2
jax: 0.10.0
libtpu: 0.0.40
codegen_flags: <defaults>
</compile_context>

<pallas_src>
import functools
import math

import jax
import jax.numpy as jnp
from jax.experimental import pallas as pl
from jax.experimental.pallas import tpu as pltpu


def _round_up(x: int, m: int) -> int:
    return (x + m - 1) // m * m


# ----------------------------------------------------------------------------
# Hardware query / tile selection
# ----------------------------------------------------------------------------
@functools.lru_cache(maxsize=None)
def _vmem_capacity_bytes() -> int:
    """Per-core VMEM capacity; conservative 64 MiB fallback (v7x per-TC)."""
    try:
        info = pltpu.get_tpu_info()
        cap = int(getattr(info, "vmem_capacity_bytes", 0))
        if cap > 0:
            return cap
    except Exception:
        pass
    return 64 * 1024 * 1024


def _select_tf(d_model: int, d_ff: int, in_bytes: int, vmem_cap: int) -> int:
    """Largest d_ff tile whose double-buffered weight tiles fit the
    generation-aware weight budget (24 MiB on 128 MiB parts, 12 MiB on v7x)."""
    dm_pad = _round_up(d_model, 128)
    big_vmem = vmem_cap >= 96 * 1024 * 1024
    weight_budget = (24 if big_vmem else 12) * 1024 * 1024
    d_ff_cap = max(128, _round_up(d_ff, 128))  # never pad d_ff past one tile
    for cand in (1024, 512, 256, 128):
        if cand <= d_ff_cap and 2 * 3 * dm_pad * cand * in_bytes <= weight_budget:
            return cand
    return 128


def _vmem_footprint(tm: int, dm_pad: int, tf: int, in_bytes: int, out_bytes: int) -> int:
    return (2 * 3 * dm_pad * tf * in_bytes   # [W1.T|W3.T] + W2.T tiles, double-buffered
            + 2 * tm * dm_pad * in_bytes     # x row tiles, double-buffered
            + 2 * tm * dm_pad * out_bytes    # out row tiles, double-buffered
            + tm * dm_pad * 4                # f32 accumulator scratch
            + 2 * tm * 2 * tf * 4)           # h / g f32 intermediates


def _select_tm(dm_pad: int, tf: int, in_bytes: int, out_bytes: int, vmem_cap: int) -> int:
    """Row tile: 128 MiB parts target ~768 rows (v6e roofline knee ~650 flop/B);
    64 MiB parts (v7x) target ~512 (knee ~310 flop/B); always fit 75% of VMEM."""
    big_vmem = vmem_cap >= 96 * 1024 * 1024
    tm_target = 768 if big_vmem else 512
    budget = int(vmem_cap * 0.75)
    for cand in range(tm_target, 127, -128):
        if _vmem_footprint(cand, dm_pad, tf, in_bytes, out_bytes) <= budget:
            return cand
    return 128


# ----------------------------------------------------------------------------
# Kernel
# ----------------------------------------------------------------------------
def _swiglu_kernel(x_ref, w13_ref, w2_ref, o_ref, acc_ref, *, tf, approx_recip):
    """One (row-tile, d_ff-tile) step of fused SwiGLU.

    x_ref   : (tm, dm_pad)      activation row tile (constant along k)
    w13_ref : (dm_pad, 2*tf)    [W1.T tile | W3.T tile] for d_ff tile k
    w2_ref  : (tf, dm_pad)      W2.T tile for d_ff tile k
    o_ref   : (tm, dm_pad)      output row tile (written once, at last k)
    acc_ref : (tm, dm_pad) f32  accumulator scratch, resident across k
    """
    k = pl.program_id(1)

    # Fused up-projection: one MXU matmul produces [h1 | h3] for this d_ff tile.
    h = jnp.dot(x_ref[...], w13_ref[...], preferred_element_type=jnp.float32)
    h1 = h[:, :tf]          # tf is a multiple of 128 -> lane-aligned slices
    h3 = h[:, tf:]

    # SiLU gate in f32: exp + reciprocal both ride the (otherwise idle) EUP slot.
    sig = pl.reciprocal(1.0 + jnp.exp(-h1), approx=approx_recip)
    g = h1 * sig * h3

    # Partial down-projection for this d_ff tile, accumulated in f32.
    partial = jnp.dot(g.astype(w2_ref.dtype), w2_ref[...],
                      preferred_element_type=jnp.float32)

    @pl.when(k == 0)
    def _():
        acc_ref[...] = partial          # direct write: no zero-fill, no RMW

    @pl.when(k > 0)
    def _():
        acc_ref[...] += partial

    @pl.when(k == pl.num_programs(1) - 1)
    def _():
        o_ref[...] = acc_ref[...].astype(o_ref.dtype)


# ----------------------------------------------------------------------------
# Weight packing (done once per weight set, outside the hot path)
# ----------------------------------------------------------------------------
def prepare_swiglu_weights(w1, w2, w3, *, tf, compute_dtype):
    """Pack PyTorch-layout weights into the streamed, fused kernel layout.

    w1, w3 : (d_ff, d_model)   w2 : (d_model, d_ff)
    Returns:
      w13t : (nk, dm_pad, 2*tf)  -- per d_ff tile k: [W1.T tile | W3.T tile],
                                    each tile one contiguous HBM slab.
      w2t  : (d_ff_pad, dm_pad)  -- W2.T, tile k = rows [k*tf, (k+1)*tf) (contiguous).
    Zero padding is exact: padded d_ff rows/cols contribute 0 to the output.
    """
    d_ff, d_model = w1.shape
    dm_pad = _round_up(d_model, 128)
    d_ff_pad = _round_up(d_ff, tf)
    nk = d_ff_pad // tf

    def pad_t(w):  # (d_ff, d_model) -> padded (dm_pad, d_ff_pad) transpose
        wt = w.T.astype(compute_dtype)
        return jnp.pad(wt, ((0, dm_pad - d_model), (0, d_ff_pad - d_ff)))

    w1t = pad_t(w1).reshape(dm_pad, nk, tf)
    w3t = pad_t(w3).reshape(dm_pad, nk, tf)
    w13t = jnp.concatenate([w1t, w3t], axis=2).transpose(1, 0, 2)  # (nk, dm_pad, 2*tf)

    w2t = jnp.pad(
        w2.T.astype(compute_dtype),
        ((0, d_ff_pad - d_ff), (0, dm_pad - d_model)),
    )
    return w13t, w2t


# ----------------------------------------------------------------------------
# Forward
# ----------------------------------------------------------------------------
def _swiglu_forward(x, w13t, w2t, *, d_model, tf, tm, compute_dtype, vmem_cap):
    orig_shape = x.shape
    out_dtype = x.dtype
    nk, dm_pad, _ = w13t.shape
    d_ff_pad = w2t.shape[0]
    in_bytes = jnp.dtype(compute_dtype).itemsize
    out_bytes = jnp.dtype(out_dtype).itemsize

    x2d = x.reshape(-1, d_model).astype(compute_dtype)
    m = x2d.shape[0]

    sub = 16 if in_bytes < 4 else 8            # bf16 packs 16 rows per vreg
    if tm is None:
        tm = _select_tm(dm_pad, tf, in_bytes, out_bytes, vmem_cap)
    tm = max(sub, min(_round_up(tm, sub), _round_up(m, sub)))  # small-batch clamp

    m_pad = _round_up(m, tm)
    x2d = jnp.pad(x2d, ((0, m_pad - m), (0, dm_pad - d_model)))

    grid = (m_pad // tm, nk)                   # rows parallel, d_ff reduction last

    vmem_est = _vmem_footprint(tm, dm_pad, tf, in_bytes, out_bytes)
    vmem_limit = int(min(vmem_cap * 0.9, max(32 * 1024 * 1024, vmem_est * 1.25)))
    vmem_limit = max(vmem_limit, vmem_est)     # never request less than we need

    n_row_tiles = m_pad // tm
    cost = pl.CostEstimate(
        flops=int(6 * m_pad * dm_pad * d_ff_pad),
        transcendentals=int(m_pad * d_ff_pad),
        bytes_accessed=int(x2d.size * in_bytes
                           + n_row_tiles * (w13t.size + w2t.size) * in_bytes
                           + m_pad * dm_pad * out_bytes),
    )

    kernel = functools.partial(
        _swiglu_kernel, tf=tf,
        approx_recip=jnp.dtype(compute_dtype) != jnp.dtype(jnp.float32))

    # TODO(synk): on 128 MiB parts (v5e/v6e), optionally deepen weight buffering
    #   with pipeline_mode=pl.Buffered(3) once per-step DMA ~= per-step compute.
    # TODO(synk): v7x decode path (m <= one row tile): split the d_ff axis across
    #   the 2 TensorCores and sum partials; consider fp8 weight operands.
    out = pl.pallas_call(
        kernel,
        out_shape=jax.ShapeDtypeStruct((m_pad, dm_pad), out_dtype),
        grid_spec=pltpu.PrefetchScalarGridSpec(
            num_scalar_prefetch=0,
            grid=grid,
            in_specs=[
                pl.BlockSpec((tm, dm_pad), lambda i, k: (i, 0)),          # x rows
                pl.BlockSpec((None, dm_pad, 2 * tf), lambda i, k: (k, 0, 0)),  # [W1.T|W3.T] tile k (contiguous)
                pl.BlockSpec((tf, dm_pad), lambda i, k: (k, 0)),          # W2.T tile k
            ],
            out_specs=pl.BlockSpec((tm, dm_pad), lambda i, k: (i, 0)),
            scratch_shapes=[pltpu.VMEM((tm, dm_pad), jnp.float32)],
        ),
        compiler_params=pltpu.CompilerParams(
            dimension_semantics=("parallel", "arbitrary"),
            vmem_limit_bytes=vmem_limit,
        ),
        cost_estimate=cost,
    )(x2d, w13t, w2t)

    out = out[:m, :d_model]                    # already in the original dtype
    return out.reshape(orig_shape)


def make_swiglu(w1, w2, w3, *, compute_dtype=jnp.bfloat16, tf=None, tm=None):
    """Pack the FFN weights once and return a forward(x) callable.

    w1, w3 : (d_ff, d_model)   w2 : (d_model, d_ff)   (PyTorch nn.Linear layout)
    compute_dtype: MXU operand dtype (bf16 default; accumulation is always f32,
    output is emitted in x.dtype).
    """
    d_ff, d_model = w1.shape
    in_bytes = jnp.dtype(compute_dtype).itemsize
    vmem_cap = _vmem_capacity_bytes()
    if tf is None:
        tf = _select_tf(d_model, d_ff, in_bytes, vmem_cap)
    w13t, w2t = prepare_swiglu_weights(w1, w2, w3, tf=tf, compute_dtype=compute_dtype)

    def forward(x):
        return _swiglu_forward(
            x, w13t, w2t, d_model=d_model, tf=tf, tm=tm,
            compute_dtype=compute_dtype, vmem_cap=vmem_cap)

    return forward


def swiglu_pallas(x, w1, w2, w3, *, compute_dtype=jnp.bfloat16, tf=None, tm=None):
    """One-shot convenience wrapper. For repeated calls with the same weights,
    use make_swiglu(...) so the packed weight layout is built only once."""
    return make_swiglu(w1, w2, w3, compute_dtype=compute_dtype, tf=tf, tm=tm)(x)


# ----------------------------------------------------------------------------
# Init helper matching _truncated_normal_init
# ----------------------------------------------------------------------------
def _trunc_normal(key, shape, dtype=jnp.float32):
    """std = sqrt(2/(fan_out+fan_in)), truncated at +-3*std. shape = (out, in)."""
    std = math.sqrt(2.0 / (shape[0] + shape[1]))
    return (jax.random.truncated_normal(key, -3.0, 3.0, shape, jnp.float32) * std).astype(dtype)


if __name__ == "__main__":
    # Small shapes consistent with the module: d_model=64 -> d_ff = round(64*8/3/64)*64 = 192
    batch, seq, d_model = 2, 8, 64
    d_ff = round(d_model * 8 / 3 / 64) * 64  # 192

    key = jax.random.PRNGKey(0)
    kx, k1, k2, k3 = jax.random.split(key, 4)

    x = jax.random.normal(kx, (batch, seq, d_model), dtype=jnp.float32)

    # PyTorch nn.Linear weights: w1,(d_ff,d_model)  w2,(d_model,d_ff)  w3,(d_ff,d_model)
    w1 = _trunc_normal(k1, (d_ff, d_model))
    w2 = _trunc_normal(k2, (d_model, d_ff))
    w3 = _trunc_normal(k3, (d_ff, d_model))

    # Reference in plain JAX (same math as the PyTorch forward), f32.
    h1 = x @ w1.T
    h3 = x @ w3.T
    ref = (h1 * jax.nn.sigmoid(h1) * h3) @ w2.T

    # 1) f32 operands -- tight numerical check (exact reciprocal path in-kernel).
    out_f32 = jax.block_until_ready(
        swiglu_pallas(x, w1, w2, w3, compute_dtype=jnp.float32))
    assert out_f32.shape == x.shape and out_f32.dtype == x.dtype
    assert jnp.allclose(out_f32, ref, atol=1e-5, rtol=1e-5), "f32 mismatch vs reference"

    # 2) Default high-throughput config: bf16 operands, f32 accumulation,
    #    output emitted directly in the activation dtype; weights packed once.
    fwd = make_swiglu(w1, w2, w3)            # compute_dtype defaults to bf16
    out_bf16 = jax.block_until_ready(fwd(x))
    assert out_bf16.shape == x.shape and out_bf16.dtype == x.dtype
    assert jnp.allclose(out_bf16, ref, atol=5e-2, rtol=5e-2), "bf16 mismatch vs reference"

    print("KERNEL_OK")
</pallas_src>

<mosaic_0001>
module attributes {stable_mosaic.version = 11 : i64} {
  func.func @_swiglu_kernel(%arg0: i32, %arg1: i32, %arg2: memref<16x128xf32, #tpu.memory_space<vmem>>, %arg3: memref<1x128x512xf32, #tpu.memory_space<vmem>>, %arg4: memref<256x128xf32, #tpu.memory_space<vmem>>, %arg5: memref<16x128xf32, #tpu.memory_space<vmem>>, %arg6: memref<16x128xf32, #tpu.memory_space<vmem>>) attributes {dimension_semantics = [#tpu.dimension_semantics<parallel>, #tpu.dimension_semantics<arbitrary>], iteration_bounds = array<i64: 1, 1>, scalar_prefetch = 0 : i64, scratch_operands = 1 : i64, tpu.core_type = #tpu.core_type<tc>, window_params = [{transform_indices = @transform_0, window_bounds = array<i64: 16, 128>}, {transform_indices = @transform_1, window_bounds = array<i64: 1, 128, 512>}, {transform_indices = @transform_2, window_bounds = array<i64: 256, 128>}, {transform_indices = @transform_3, window_bounds = array<i64: 16, 128>}]} {
    %c0 = arith.constant 0 : index
    %c0_0 = arith.constant 0 : index
    %0 = vector.load %arg2[%c0, %c0_0] : memref<16x128xf32, #tpu.memory_space<vmem>>, vector<16x128xf32>
    %c0_1 = arith.constant 0 : index
    %c0_2 = arith.constant 0 : index
    %c0_3 = arith.constant 0 : index
    %1 = vector.load %arg3[%c0_1, %c0_2, %c0_3] : memref<1x128x512xf32, #tpu.memory_space<vmem>>, vector<1x128x512xf32>
    %2 = vector.shape_cast %1 : vector<1x128x512xf32> to vector<128x512xf32>
    %cst = arith.constant dense<0.000000e+00> : vector<16x512xf32>
    %3 = tpu.matmul %0, %2, %cst {dimension_numbers = #tpu.dot_dimension_numbers<[1], [0], [0], [1], [0, 0, 1, 1], [], []>} : vector<16x128xf32>, vector<128x512xf32>, vector<16x512xf32> -> vector<16x512xf32>
    %4 = vector.extract_strided_slice %3 {offsets = [0, 0], sizes = [16, 256], strides = [1, 1]} : vector<16x512xf32> to vector<16x256xf32>
    %5 = vector.extract_strided_slice %3 {offsets = [0, 256], sizes = [16, 256], strides = [1, 1]} : vector<16x512xf32> to vector<16x256xf32>
    %cst_4 = arith.constant 0.000000e+00 : f32
    %6 = vector.broadcast %cst_4 : f32 to vector<16x256xf32>
    %7 = arith.subf %6, %4 : vector<16x256xf32>
    %8 = math.exp %7 : vector<16x256xf32>
    %cst_5 = arith.constant 1.000000e+00 : f32
    %9 = vector.broadcast %cst_5 : f32 to vector<16x256xf32>
    %10 = arith.addf %9, %8 : vector<16x256xf32>
    %11 = tpu.reciprocal %10 : vector<16x256xf32> -> vector<16x256xf32>
    %12 = arith.mulf %4, %11 : vector<16x256xf32>
    %13 = arith.mulf %12, %5 : vector<16x256xf32>
    %c0_6 = arith.constant 0 : index
    %c0_7 = arith.constant 0 : index
    %14 = vector.load %arg4[%c0_6, %c0_7] : memref<256x128xf32, #tpu.memory_space<vmem>>, vector<256x128xf32>
    %cst_8 = arith.constant dense<0.000000e+00> : vector<16x128xf32>
    %15 = tpu.matmul %13, %14, %cst_8 {dimension_numbers = #tpu.dot_dimension_numbers<[1], [0], [0], [1], [0, 0, 1, 1], [], []>} : vector<16x256xf32>, vector<256x128xf32>, vector<16x128xf32> -> vector<16x128xf32>
    %c0_i32 = arith.constant 0 : i32
    %16 = arith.cmpi eq, %arg1, %c0_i32 : i32
    %17 = arith.extui %16 : i1 to i32
    %c0_i32_9 = arith.constant 0 : i32
    %18 = arith.cmpi ne, %17, %c0_i32_9 : i32
    scf.if %18 {
      %c0_14 = arith.constant 0 : index
      %c0_15 = arith.constant 0 : index
      %25 = vector.load %arg6[%c0_14, %c0_15] : memref<16x128xf32, #tpu.memory_space<vmem>>, vector<16x128xf32>
      tpu.vector_store %arg6[%c0_14, %c0_15], %15 {strides = array<i32>} : memref<16x128xf32, #tpu.memory_space<vmem>>, vector<16x128xf32>,
    } else {
    }
    %c0_i32_10 = arith.constant 0 : i32
    %19 = arith.cmpi sgt, %arg1, %c0_i32_10 : i32
    %20 = arith.extui %19 : i1 to i32
    %c0_i32_11 = arith.constant 0 : i32
    %21 = arith.cmpi ne, %20, %c0_i32_11 : i32
    scf.if %21 {
      %c0_14 = arith.constant 0 : index
      %c0_15 = arith.constant 0 : index
      %25 = vector.load %arg6[%c0_14, %c0_15] : memref<16x128xf32, #tpu.memory_space<vmem>>, vector<16x128xf32>
      %26 = arith.addf %25, %15 : vector<16x128xf32>
      %c0_16 = arith.constant 0 : index
      %c0_17 = arith.constant 0 : index
      %27 = vector.load %arg6[%c0_16, %c0_17] : memref<16x128xf32, #tpu.memory_space<vmem>>, vector<16x128xf32>
      tpu.vector_store %arg6[%c0_16, %c0_17], %26 {strides = array<i32>} : memref<16x128xf32, #tpu.memory_space<vmem>>, vector<16x128xf32>,
    } else {
    }
    %c0_i32_12 = arith.constant 0 : i32
    %22 = arith.cmpi eq, %arg1, %c0_i32_12 : i32
    %23 = arith.extui %22 : i1 to i32
    %c0_i32_13 = arith.constant 0 : i32
    %24 = arith.cmpi ne, %23, %c0_i32_13 : i32
    scf.if %24 {
      %c0_14 = arith.constant 0 : index
      %c0_15 = arith.constant 0 : index
      %25 = vector.load %arg6[%c0_14, %c0_15] : memref<16x128xf32, #tpu.memory_space<vmem>>, vector<16x128xf32>
      %c0_16 = arith.constant 0 : index
      %c0_17 = arith.constant 0 : index
      %26 = vector.load %arg5[%c0_16, %c0_17] : memref<16x128xf32, #tpu.memory_space<vmem>>, vector<16x128xf32>
      tpu.vector_store %arg5[%c0_16, %c0_17], %25 {strides = array<i32>} : memref<16x128xf32, #tpu.memory_space<vmem>>, vector<16x128xf32>,
    } else {
    }
    return
  }
  func.func @transform_0(%arg0: i32, %arg1: i32) -> (i32, i32) {
    %c0_i32 = arith.constant 0 : i32
    %c0_i32_0 = arith.constant 0 : i32
    return %arg0, %c0_i32 : i32, i32
  }
  func.func @transform_1(%arg0: i32, %arg1: i32) -> (i32, i32, i32) {
    %c0_i32 = arith.constant 0 : i32
    %c0_i32_0 = arith.constant 0 : i32
    %c0_i32_1 = arith.constant 0 : i32
    return %arg1, %c0_i32, %c0_i32_0 : i32, i32, i32
  }
  func.func @transform_2(%arg0: i32, %arg1: i32) -> (i32, i32) {
    %c0_i32 = arith.constant 0 : i32
    %c0_i32_0 = arith.constant 0 : i32
    return %arg1, %c0_i32 : i32, i32
  }
  func.func @transform_3(%arg0: i32, %arg1: i32) -> (i32, i32) {
    %c0_i32 = arith.constant 0 : i32
    %c0_i32_0 = arith.constant 0 : i32
    return %arg0, %c0_i32 : i32, i32
  }
}

</mosaic_0001>

<bundles_post_ra>
// kernel: tpu_custom_call.1
= control target key start
LH: loop header
LB: loop body
LE: loop exit
PB: predicated region body
PF: predicated region fallthrough
CT: control target
= control target key end

     0   :  { %8 = vsyncpa [#allocation4], 0  ;;  %s644_s0 = inlined_call_operand.hbm [shape: f32[16,128], index: 0, kind: input, shape index: {}]   ;;  %s645_s1 = inlined_call_operand.hbm [shape: f32[1,128,512], index: 1, kind: input, shape index: {}]   ;;  %s646_s2 = inlined_call_operand.hbm [shape: f32[256,128], index: 2, kind: input, shape index: {}]   ;;  %s647_s3 = inlined_call_operand.hbm [shape: f32[16,128], index: 3, kind: output, shape index: {}]  }
   0x1   :  { %9 = vsyncpa [#allocation7], 0  ;;  %s28_s14 = sshll.u32 %s645_s1, 4  ;;  %s29_s14 = int_to_ptr.hbm [resolvable:$true] %s28_s14 }
   0x2   :  { %10 = vsyncpa [#allocation5], 0  ;;  %s579_s15 = smov [#allocation6]   ;;  %s15_s19 = sshll.u32 %s644_s0, 4  ;;  %s16_s19 = int_to_ptr.hbm [resolvable:$true] %s15_s19 }
   0x3   :  { %s30_s16 = sshll.u32 %s579_s15, 4  ;;  %s580_s20 = smov 512   ;;  %s31_s16 = int_to_ptr.vmem [resolvable:$true] %s30_s16 }
   0x4   :  { %s581_s21 = smov 32   ;;  %s582_s22 = smov [#allocation3]  }
   0x5   :  { %36 = dma.hbm_to_vmem [thread:$0]  %s29_s14, 8192, %s31_s16, [#allocation7], %s580_s20, %s580_s20, %s581_s21  }
   0x6   :  { %s17_s23 = sshll.u32 %s582_s22, 4  ;;  %s583_s24 = smov 128   ;;  %s18_s23 = int_to_ptr.vmem [resolvable:$true] %s17_s23 }
   0x7   :  { %s584_s25 = smov 8   ;;  %s41_s27 = sshll.u32 %s646_s2, 4  ;;  %s42_s27 = int_to_ptr.hbm [resolvable:$true] %s41_s27 }
   0x8   :  { %23 = dma.hbm_to_vmem [thread:$0]  %s16_s19, 256, %s18_s23, [#allocation4], %s583_s24, %s583_s24, %s584_s25  }
   0x9   :  { %s585_s28 = smov [#allocation8]  }
   0xa   :  { %s43_s0 = sshll.u32 %s585_s28, 4  ;;  %s44_s0 = int_to_ptr.vmem [resolvable:$true] %s43_s0 }
   0xb   :  { %49 = dma.hbm_to_vmem [thread:$0]  %s42_s27, 4096, %s44_s0, [#allocation7], %s583_s24, %s583_s24, %s584_s25  }
   0xc   :  { %573 = dma.done.wait [#allocation4], 256  }
   0xd   :  { %574 = vsyncadd [#allocation4], 4294967040 }
   0xe   :  { %575 = dma.done.wait [#allocation7], 12288  }
   0xf   :  { %576 = vsyncadd [#allocation7], 4294955008  ;;  %v124_v0 = vld [vmem:[#allocation6 + $0x1e0] sm:$0xff]  ;;  %v125_v1 = vld [vmem:[#allocation6 + $0x1e8] sm:$0xff]  ;;  %s586_s2 = smov [#allocation9]   ;;  %s407_s5 = sshll.u32 %s647_s3, 4  ;;  %s408_s5 = int_to_ptr.hbm [resolvable:$true] %s407_s5 }
  0x10   :  { %v120_v2 = vld [vmem:[#allocation6 + $0x1c0] sm:$0xff]  ;;  %128 = vmatpush.msra.mxu0 %v124_v0  ;;  %151 = vmatpush.msra.mxu1 %v125_v1  ;;  %v121_v3 = vld [vmem:[#allocation6 + $0x1c8] sm:$0xff]  ;;  %v126_v12 = vld [vmem:[#allocation6 + $0x1f0] sm:$0xff]  ;;  %s405_s29 = sshll.u32 %s586_s2, 4  ;;  %s406_s29 = int_to_ptr.vmem [resolvable:$true] %s405_s29 }
  0x11   :  { %v116_v4 = vld [vmem:[#allocation6 + $0x1a0] sm:$0xff]  ;;  %v117_v5 = vld [vmem:[#allocation6 + $0x1a8] sm:$0xff]  ;;  %v127_v13 = vld [vmem:[#allocation6 + $0x1f8] sm:$0xff]  ;;  %174 = vmatpush.msra.mxu2 %v126_v12 }
  0x12   :  { %129 = vmatpush.msra.mxu0 %v120_v2  ;;  %152 = vmatpush.msra.mxu1 %v121_v3  ;;  %v112_v6 = vld [vmem:[#allocation6 + $0x180] sm:$0xff]  ;;  %v113_v7 = vld [vmem:[#allocation6 + $0x188] sm:$0xff]  ;;  %v122_v16 = vld [vmem:[#allocation6 + $0x1d0] sm:$0xff] }
  0x13   :  { %v108_v8 = vld [vmem:[#allocation6 + $0x160] sm:$0xff]  ;;  %v109_v9 = vld [vmem:[#allocation6 + $0x168] sm:$0xff]  ;;  %197 = vmatpush.msra.mxu3 %v127_v13  ;;  %v123_v18 = vld [vmem:[#allocation6 + $0x1d8] sm:$0xff]  ;;  %175 = vmatpush.msra.mxu2 %v122_v16 }
  0x14   :  { %130 = vmatpush.msra.mxu0 %v116_v4  ;;  %153 = vmatpush.msra.mxu1 %v117_v5  ;;  %v104_v10 = vld [vmem:[#allocation6 + $0x140] sm:$0xff]  ;;  %v105_v11 = vld [vmem:[#allocation6 + $0x148] sm:$0xff]  ;;  %v118_v20 = vld [vmem:[#allocation6 + $0x1b0] sm:$0xff] }
  0x15   :  { %v100_v14 = vld [vmem:[#allocation6 + $0x120] sm:$0xff]  ;;  %v101_v15 = vld [vmem:[#allocation6 + $0x128] sm:$0xff]  ;;  %198 = vmatpush.msra.mxu3 %v123_v18  ;;  %v119_v21 = vld [vmem:[#allocation6 + $0x1b8] sm:$0xff]  ;;  %176 = vmatpush.msra.mxu2 %v118_v20 }
  0x16   :  { %131 = vmatpush.msra.mxu0 %v112_v6  ;;  %154 = vmatpush.msra.mxu1 %v113_v7  ;;  %v96_v17 = vld [vmem:[#allocation6 + $0x100] sm:$0xff]  ;;  %v97_v19 = vld [vmem:[#allocation6 + $0x108] sm:$0xff]  ;;  %v114_v22 = vld [vmem:[#allocation6 + $0x190] sm:$0xff] }
  0x17   :  { %v115_v23 = vld [vmem:[#allocation6 + $0x198] sm:$0xff]  ;;  %v92_v24 = vld [vmem:[#allocation6 + $0xe0] sm:$0xff]  ;;  %v93_v25 = vld [vmem:[#allocation6 + $0xe8] sm:$0xff]  ;;  %199 = vmatpush.msra.mxu3 %v119_v21  ;;  %177 = vmatpush.msra.mxu2 %v114_v22 }
  0x18   :  { %132 = vmatpush.msra.mxu0 %v108_v8  ;;  %155 = vmatpush.msra.mxu1 %v109_v9  ;;  %v110_v26 = vld [vmem:[#allocation6 + $0x170] sm:$0xff]  ;;  %v111_v27 = vld [vmem:[#allocation6 + $0x178] sm:$0xff]  ;;  %v88_v28 = vld [vmem:[#allocation6 + $0xc0] sm:$0xff] }
  0x19   :  { %v89_v29 = vld [vmem:[#allocation6 + $0xc8] sm:$0xff]  ;;  %200 = vmatpush.msra.mxu3 %v115_v23  ;;  %v106_v30 = vld [vmem:[#allocation6 + $0x150] sm:$0xff]  ;;  %v107_v31 = vld [vmem:[#allocation6 + $0x158] sm:$0xff]  ;;  %178 = vmatpush.msra.mxu2 %v110_v26 }
  0x1a   :  { %133 = vmatpush.msra.mxu0 %v104_v10  ;;  %156 = vmatpush.msra.mxu1 %v105_v11  ;;  %v84_v32 = vld [vmem:[#allocation6 + $0xa0] sm:$0xff]  ;;  %v85_v33 = vld [vmem:[#allocation6 + $0xa8] sm:$0xff]  ;;  %v102_v34 = vld [vmem:[#allocation6 + $0x130] sm:$0xff] }
  0x1b   :  { %201 = vmatpush.msra.mxu3 %v111_v27  ;;  %v103_v35 = vld [vmem:[#allocation6 + $0x138] sm:$0xff]  ;;  %v80_v36 = vld [vmem:[#allocation6 + $0x80] sm:$0xff]  ;;  %v81_v37 = vld [vmem:[#allocation6 + $0x88] sm:$0xff]  ;;  %179 = vmatpush.msra.mxu2 %v106_v30 }
  0x1c   :  { %134 = vmatpush.msra.mxu0 %v100_v14  ;;  %157 = vmatpush.msra.mxu1 %v101_v15  ;;  %v98_v38 = vld [vmem:[#allocation6 + $0x110] sm:$0xff]  ;;  %v99_v39 = vld [vmem:[#allocation6 + $0x118] sm:$0xff]  ;;  %v76_v40 = vld [vmem:[#allocation6 + $0x60] sm:$0xff] }
  0x1d   :  { %202 = vmatpush.msra.mxu3 %v107_v31  ;;  %v77_v41 = vld [vmem:[#allocation6 + $0x68] sm:$0xff]  ;;  %180 = vmatpush.msra.mxu2 %v102_v34  ;;  %v94_v42 = vld [vmem:[#allocation6 + $0xf0] sm:$0xff]  ;;  %v95_v43 = vld [vmem:[#allocation6 + $0xf8] sm:$0xff] }
  0x1e   :  { %135 = vmatpush.msra.mxu0 %v96_v17  ;;  %158 = vmatpush.msra.mxu1 %v97_v19  ;;  %v72_v44 = vld [vmem:[#allocation6 + $0x40] sm:$0xff]  ;;  %v73_v45 = vld [vmem:[#allocation6 + $0x48] sm:$0xff]  ;;  %v90_v46 = vld [vmem:[#allocation6 + $0xd0] sm:$0xff] }
  0x1f   :  { %203 = vmatpush.msra.mxu3 %v103_v35  ;;  %181 = vmatpush.msra.mxu2 %v98_v38  ;;  %v91_v47 = vld [vmem:[#allocation6 + $0xd8] sm:$0xff]  ;;  %v68_v48 = vld [vmem:[#allocation6 + $0x20] sm:$0xff]  ;;  %v69_v49 = vld [vmem:[#allocation6 + $0x28] sm:$0xff] }
  0x20   :  { %136 = vmatpush.msra.mxu0 %v92_v24  ;;  %159 = vmatpush.msra.mxu1 %v93_v25  ;;  %v86_v50 = vld [vmem:[#allocation6 + $0xb0] sm:$0xff]  ;;  %v87_v51 = vld [vmem:[#allocation6 + $0xb8] sm:$0xff]  ;;  %v64_v52 = vld [vmem:[#allocation6] sm:$0xff] }
  0x21   :  { %204 = vmatpush.msra.mxu3 %v99_v39  ;;  %182 = vmatpush.msra.mxu2 %v94_v42  ;;  %v65_v53 = vld [vmem:[#allocation6 + $0x8] sm:$0xff]  ;;  %v62_v54 = vld [vmem:[#allocation3] sm:$0xff]  ;;  %v83_v56 = vld [vmem:[#allocation6 + $0x98] sm:$0xff] }
  0x22   :  { %137 = vmatpush.msra.mxu0 %v88_v28  ;;  %160 = vmatpush.msra.mxu1 %v89_v29  ;;  %v82_v55 = vld [vmem:[#allocation6 + $0x90] sm:$0xff]  ;;  %v79_v58 = vld [vmem:[#allocation6 + $0x78] sm:$0xff]  ;;  %v313_v6 = vld [vmem:[#allocation8 + $0x68] sm:$0xff] }
  0x23   :  { %205 = vmatpush.msra.mxu3 %v95_v43  ;;  %183 = vmatpush.msra.mxu2 %v90_v46  ;;  %v78_v57 = vld [vmem:[#allocation6 + $0x70] sm:$0xff]  ;;  %v75_v60 = vld [vmem:[#allocation6 + $0x58] sm:$0xff]  ;;  %v329_v7 = vld [vmem:[#allocation8 + $0xe8] sm:$0xff] }
  0x24   :  { %138 = vmatpush.msra.mxu0 %v84_v32  ;;  %161 = vmatpush.msra.mxu1 %v85_v33  ;;  %v74_v59 = vld [vmem:[#allocation6 + $0x50] sm:$0xff]  ;;  %v71_v62 = vld [vmem:[#allocation6 + $0x38] sm:$0xff]  ;;  %v312_v8 = vld [vmem:[#allocation8 + $0x60] sm:$0xff] }
  0x25   :  { %206 = vmatpush.msra.mxu3 %v91_v47  ;;  %184 = vmatpush.msra.mxu2 %v86_v50  ;;  %v70_v61 = vld [vmem:[#allocation6 + $0x30] sm:$0xff]  ;;  %v63_v63 = vld [vmem:[#allocation3 + $0x8] sm:$0xff]  ;;  %v328_v9 = vld [vmem:[#allocation8 + $0xe0] sm:$0xff] }
  0x26   :  { %139 = vmatpush.msra.mxu0 %v80_v36  ;;  %162 = vmatpush.msra.mxu1 %v81_v37  ;;  %v66_v0 = vld [vmem:[#allocation6 + $0x10] sm:$0xff]  ;;  %v67_v1 = vld [vmem:[#allocation6 + $0x18] sm:$0xff]  ;;  %v309_v14 = vld [vmem:[#allocation8 + $0x48] sm:$0xff] }
  0x27   :  { %207 = vmatpush.msra.mxu3 %v87_v51  ;;  %185 = vmatpush.msra.mxu2 %v82_v55  ;;  %v315_v2 = vld [vmem:[#allocation8 + $0x78] sm:$0xff]  ;;  %v314_v4 = vld [vmem:[#allocation8 + $0x70] sm:$0xff]  ;;  %v325_v15 = vld [vmem:[#allocation8 + $0xc8] sm:$0xff] }
  0x28   :  { %140 = vmatpush.msra.mxu0 %v76_v40  ;;  %163 = vmatpush.msra.mxu1 %v77_v41  ;;  %v331_v3 = vld [vmem:[#allocation8 + $0xf8] sm:$0xff]  ;;  %v330_v5 = vld [vmem:[#allocation8 + $0xf0] sm:$0xff]  ;;  %v308_v16 = vld [vmem:[#allocation8 + $0x40] sm:$0xff] }
  0x29   :  { %208 = vmatpush.msra.mxu3 %v83_v56  ;;  %186 = vmatpush.msra.mxu2 %v78_v57  ;;  %v311_v10 = vld [vmem:[#allocation8 + $0x58] sm:$0xff]  ;;  %v310_v12 = vld [vmem:[#allocation8 + $0x50] sm:$0xff]  ;;  %v324_v17 = vld [vmem:[#allocation8 + $0xc0] sm:$0xff] }
  0x2a   :  { %141 = vmatpush.msra.mxu0 %v72_v44  ;;  %164 = vmatpush.msra.mxu1 %v73_v45  ;;  %v327_v11 = vld [vmem:[#allocation8 + $0xd8] sm:$0xff]  ;;  %v326_v13 = vld [vmem:[#allocation8 + $0xd0] sm:$0xff]  ;;  %v305_v22 = vld [vmem:[#allocation8 + $0x28] sm:$0xff] }
  0x2b   :  { %209 = vmatpush.msra.mxu3 %v79_v58  ;;  %187 = vmatpush.msra.mxu2 %v74_v59  ;;  %v307_v18 = vld [vmem:[#allocation8 + $0x38] sm:$0xff]  ;;  %v306_v20 = vld [vmem:[#allocation8 + $0x30] sm:$0xff]  ;;  %v321_v23 = vld [vmem:[#allocation8 + $0xa8] sm:$0xff] }
  0x2c   :  { %142 = vmatpush.msra.mxu0 %v68_v48  ;;  %165 = vmatpush.msra.mxu1 %v69_v49  ;;  %v323_v19 = vld [vmem:[#allocation8 + $0xb8] sm:$0xff]  ;;  %v322_v21 = vld [vmem:[#allocation8 + $0xb0] sm:$0xff]  ;;  %v304_v24 = vld [vmem:[#allocation8 + $0x20] sm:$0xff] }
  0x2d   :  { %210 = vmatpush.msra.mxu3 %v75_v60  ;;  %188 = vmatpush.msra.mxu2 %v70_v61  ;;  %v320_v25 = vld [vmem:[#allocation8 + $0xa0] sm:$0xff]  ;;  %v303_v26 = vld [vmem:[#allocation8 + $0x18] sm:$0xff]  ;;  %v302_v32 = vld [vmem:[#allocation8 + $0x10] sm:$0xff] }
  0x2e   :  { %143 = vmatpush.msra.mxu0 %v64_v52  ;;  %166 = vmatpush.msra.mxu1 %v65_v53  ;;  %v319_v27 = vld [vmem:[#allocation8 + $0x98] sm:$0xff]  ;;  %v318_v33 = vld [vmem:[#allocation8 + $0x90] sm:$0xff]  ;;  %v301_v36 = vld [vmem:[#allocation8 + $0x8] sm:$0xff] }
  0x2f   :  { %144 = vmatmul.f32.vlgmr.msra.gmra.mxu0 %v62_v54  ;;  %167 = vmatmul.f32.vlgmr.msra.gmra.mxu1 %v62_v54  ;;  %v317_v37 = vld [vmem:[#allocation8 + $0x88] sm:$0xff]  ;;  %v300_v38 = vld [vmem:[#allocation8] sm:$0xff] }
  0x30   :  { %211 = vmatpush.msra.mxu3 %v71_v62  ;;  %189 = vmatpush.msra.mxu2 %v66_v0  ;;  %v316_v39 = vld [vmem:[#allocation8 + $0x80] sm:$0xff] }
  0x31   :  { %190 = vmatmul.f32.vlgmr.msra.gmra.mxu2 %v62_v54  ;;  %332 = vmatpush.msrb.mxu0 %v315_v2 }
  0x32   :  { %212 = vmatpush.msra.mxu3 %v67_v1  ;;  %355 = vmatpush.msrb.mxu1 %v331_v3 }
  0x33   :  { %213 = vmatmul.f32.vlgmr.msra.gmra.mxu3 %v62_v54  ;;  %421 = vmatpush.msrb.mxu2 %v315_v2 }
  0x34   :  { %437 = vmatpush.msrb.mxu3 %v331_v3  ;;  %333 = vmatpush.msrb.mxu0 %v314_v4 }
  0x35   :  { %356 = vmatpush.msrb.mxu1 %v330_v5  ;;  %422 = vmatpush.msrb.mxu2 %v314_v4 }
  0x36   :  { %438 = vmatpush.msrb.mxu3 %v330_v5  ;;  %334 = vmatpush.msrb.mxu0 %v313_v6 }
  0x37   :  { %147 = vmatmul.f32.gmra.mxu0 %v63_v63  ;;  %170 = vmatmul.f32.gmra.mxu1 %v63_v63 }
  0x38   :  { %357 = vmatpush.msrb.mxu1 %v329_v7  ;;  %423 = vmatpush.msrb.mxu2 %v313_v6 }
  0x39   :  { %193 = vmatmul.f32.gmra.mxu2 %v63_v63  ;;  %439 = vmatpush.msrb.mxu3 %v329_v7 }
  0x3a   :  { %335 = vmatpush.msrb.mxu0 %v312_v8  ;;  %358 = vmatpush.msrb.mxu1 %v328_v9 }
  0x3b   :  { %216 = vmatmul.f32.gmra.mxu3 %v63_v63  ;;  %424 = vmatpush.msrb.mxu2 %v312_v8 }
  0x3c   :  { %440 = vmatpush.msrb.mxu3 %v328_v9  ;;  %336 = vmatpush.msrb.mxu0 %v311_v10 }
  0x3d   :  { %359 = vmatpush.msrb.mxu1 %v327_v11  ;;  %425 = vmatpush.msrb.mxu2 %v311_v10 }
  0x3e   :  { %441 = vmatpush.msrb.mxu3 %v327_v11  ;;  %337 = vmatpush.msrb.mxu0 %v310_v12 }
  0x3f   :  { %360 = vmatpush.msrb.mxu1 %v326_v13  ;;  %426 = vmatpush.msrb.mxu2 %v310_v12 }
  0x40   :  { %442 = vmatpush.msrb.mxu3 %v326_v13  ;;  %338 = vmatpush.msrb.mxu0 %v309_v14 }
  0x41   :  { %361 = vmatpush.msrb.mxu1 %v325_v15  ;;  %427 = vmatpush.msrb.mxu2 %v309_v14 }
  0x42   :  { %443 = vmatpush.msrb.mxu3 %v325_v15  ;;  %339 = vmatpush.msrb.mxu0 %v308_v16 }
  0x43   :  { %362 = vmatpush.msrb.mxu1 %v324_v17  ;;  %428 = vmatpush.msrb.mxu2 %v308_v16 }
  0x44   :  { %444 = vmatpush.msrb.mxu3 %v324_v17  ;;  %340 = vmatpush.msrb.mxu0 %v307_v18 }
  0x45   :  { %363 = vmatpush.msrb.mxu1 %v323_v19  ;;  %429 = vmatpush.msrb.mxu2 %v307_v18 }
  0x46   :  { %445 = vmatpush.msrb.mxu3 %v323_v19  ;;  %341 = vmatpush.msrb.mxu0 %v306_v20 }
  0x47   :  { %364 = vmatpush.msrb.mxu1 %v322_v21  ;;  %430 = vmatpush.msrb.mxu2 %v306_v20 }
  0x48   :  { %446 = vmatpush.msrb.mxu3 %v322_v21  ;;  %342 = vmatpush.msrb.mxu0 %v305_v22 }
  0x49   :  { %365 = vmatpush.msrb.mxu1 %v321_v23  ;;  %431 = vmatpush.msrb.mxu2 %v305_v22 }
  0x4a   :  { %447 = vmatpush.msrb.mxu3 %v321_v23  ;;  %343 = vmatpush.msrb.mxu0 %v304_v24 }
  0x4b   :  { %366 = vmatpush.msrb.mxu1 %v320_v25  ;;  %432 = vmatpush.msrb.mxu2 %v304_v24 }
  0x4c   :  { %448 = vmatpush.msrb.mxu3 %v320_v25  ;;  %344 = vmatpush.msrb.mxu0 %v303_v26 }
  0x4d   :  { %367 = vmatpush.msrb.mxu1 %v319_v27  ;;  %433 = vmatpush.msrb.mxu2 %v303_v26 }
  0x4e   :  { %449 = vmatpush.msrb.mxu3 %v319_v27  ;;  %345 = vmatpush.msrb.mxu0 %v302_v32 }
  0x4f   :  { %368 = vmatpush.msrb.mxu1 %v318_v33  ;;  %434 = vmatpush.msrb.mxu2 %v302_v32 }
  0x50   :  { %450 = vmatpush.msrb.mxu3 %v318_v33  ;;  %346 = vmatpush.msrb.mxu0 %v301_v36 }
  0x51   :  { %369 = vmatpush.msrb.mxu1 %v317_v37  ;;  %435 = vmatpush.msrb.mxu2 %v301_v36 }
  0x52   :  { %451 = vmatpush.msrb.mxu3 %v317_v37  ;;  %347 = vmatpush.msrb.mxu0 %v300_v38 }
  0x53   :  { %370 = vmatpush.msrb.mxu1 %v316_v39  ;;  %436 = vmatpush.msrb.mxu2 %v300_v38 }
  0x54   :  { %452 = vmatpush.msrb.mxu3 %v316_v39 }
  0xac   :  { %v622_v28 = vpop.f32.mrf.mxu0  ;;  %v624_v29 = vpop.f32.mrf.mxu1 }
  0xad   :  { %v220_v30 = vsub.f32 0.0, %v622_v28  ;;  %v221_v31 = vsub.f32 0.0, %v624_v29 }
  0xaf   :  { %v224_v34 = vmul.f32 1.442695, %v220_v30  ;;  %v226_v35 = vmul.f32 1.442695, %v221_v31 }
  0xb1   :  { %461 = vpow2.f32 %v224_v34 }
  0xb2   :  { %463 = vpow2.f32 %v226_v35 }
  0xb4   :  { %v628_v40 = vpop.f32.mrf.mxu0  ;;  %v630_v41 = vpop.f32.mrf.mxu1 }
  0xb5   :  { %v222_v42 = vsub.f32 0.0, %v628_v40  ;;  %v223_v43 = vsub.f32 0.0, %v630_v41  ;;  %v191_v6 = vpop.f32.mrf.mxu2 }
  0xb6   :  { %v214_v16 = vpop.f32.mrf.mxu3 }
  0xb7   :  { %v462_v44 = vpop.eup %461  ;;  %v228_v45 = vmul.f32 1.442695, %v222_v42  ;;  %v230_v48 = vmul.f32 1.442695, %v223_v43 }
  0xb8   :  { %v464_v46 = vpop.eup %463  ;;  %v232_v47 = vadd.f32 1.0, %v462_v44 }
  0xb9   :  { %v233_v49 = vadd.f32 1.0, %v464_v46  ;;  %465 = vpow2.f32 %v228_v45 }
  0xba   :  { %467 = vrcp.f32 %v232_v47  ;;  %v245_v59 = vand.u32 2147483647, %v232_v47  ;;  %v247_v60 = vand.u32 2147483648, %v232_v47  ;;  %vm241_vm2 = vweird.f32 %v232_v47 }
  0xbb   :  { %469 = vrcp.f32 %v233_v49  ;;  %v261_v63 = vand.u32 2147483648, %v233_v49  ;;  %v259_v1 = vand.u32 2147483647, %v233_v49  ;;  %vm255_vm4 = vweird.f32 %v233_v49 }
  0xbc   :  { %471 = vpow2.f32 %v230_v48  ;;  %v248_v4 = vor.u32 1.1754944e-38, %v247_v60  ;;  %vm246_vm5 = vcmp.eq.f32.partialorder %v245_v59, 8.507059e+37 }
  0xbd   :  { %v262_v8 = vor.u32 1.1754944e-38, %v261_v63  ;;  %vm260_vm7 = vcmp.eq.f32.partialorder %v259_v1, 8.507059e+37  ;;  %v194_v33 = vpop.f32.mrf.mxu2 }
  0xbe   :  { %v217_v39 = vpop.f32.mrf.mxu3 }
  0xbf   :  { %v466_v50 = vpop.eup %465 }
  0xc0   :  { %v468_v51 = vpop.eup %467  ;;  %v234_v52 = vadd.f32 1.0, %v466_v50 }
  0xc1   :  { %v470_v53 = vpop.eup %469  ;;  %v237_v54 = vmul.f32 %v468_v51, %v232_v47  ;;  %vm242_vm0 = vweird.f32 %v468_v51 }
  0xc2   :  { %v472_v55 = vpop.eup %471  ;;  %v251_v56 = vmul.f32 %v470_v53, %v233_v49  ;;  %473 = vrcp.f32 %v234_v52  ;;  %vm256_vm1 = vweird.f32 %v470_v53  ;;  %vm243_vm3 = vmor %vm241_vm2, %vm242_vm0  ;;  %v275_v18 = vand.u32 2147483648, %v234_v52 }
  0xc3   :  { %v238_v57 = vsub.f32 1.0, %v237_v54  ;;  %v235_v58 = vadd.f32 1.0, %v472_v55  ;;  %vm257_vm6 = vmor %vm255_vm4, %vm256_vm1  ;;  %v273_v21 = vand.u32 2147483647, %v234_v52  ;;  %vm269_vm9 = vweird.f32 %v234_v52 }
  0xc4   :  { %v252_v61 = vsub.f32 1.0, %v251_v56  ;;  %v276_v27 = vor.u32 1.1754944e-38, %v275_v18 }
  0xc5   :  { %v239_v62 = vmul.f32 %v468_v51, %v238_v57  ;;  %475 = vrcp.f32 %v235_v58  ;;  %v289_v26 = vand.u32 2147483648, %v235_v58  ;;  %v287_v30 = vand.u32 2147483647, %v235_v58 }
  0xc6   :  { %v253_v0 = vmul.f32 %v470_v53, %v252_v61  ;;  %vm274_vm12 = vcmp.eq.f32.partialorder %v273_v21, 8.507059e+37  ;;  %vm283_vm13 = vweird.f32 %v235_v58 }
  0xc7   :  { %v240_v2 = vadd.f32 %v468_v51, %v239_v62  ;;  %v290_v35 = vor.u32 1.1754944e-38, %v289_v26  ;;  %vm288_vm15 = vcmp.eq.f32.partialorder %v287_v30, 8.507059e+37 }
  0xc8   :  { %v474_v3 = vpop.eup %473  ;;  %v254_v5 = vadd.f32 %v470_v53, %v253_v0 }
  0xc9   :  { %v244_v7 = vsel %vm243_vm3, %v468_v51, %v240_v2  ;;  %v265_v9 = vmul.f32 %v474_v3, %v234_v52  ;;  %vm270_vm8 = vweird.f32 %v474_v3 }
  0xca   :  { %v249_v10 = vsel %vm246_vm5, %v248_v4, %v244_v7  ;;  %v258_v11 = vsel %vm257_vm6, %v470_v53, %v254_v5  ;;  %vm271_vm10 = vmor %vm269_vm9, %vm270_vm8 }
  0xcb   :  { %v476_v12 = vpop.eup %475  ;;  %v292_v13 = vmul.f32 %v249_v10, %v622_v28  ;;  %v263_v14 = vsel %vm260_vm7, %v262_v8, %v258_v11  ;;  %v266_v15 = vsub.f32 1.0, %v265_v9 }
  0xcc   :  { %v293_v17 = vmul.f32 %v263_v14, %v624_v29  ;;  %v279_v19 = vmul.f32 %v476_v12, %v235_v58  ;;  %vm284_vm11 = vweird.f32 %v476_v12 }
  0xcd   :  { %v267_v20 = vmul.f32 %v474_v3, %v266_v15  ;;  %v296_v22 = vmul.f32 %v292_v13, %v191_v6  ;;  %vm285_vm14 = vmor %vm283_vm13, %vm284_vm11 }
  0xce   :  { %v280_v23 = vsub.f32 1.0, %v279_v19  ;;  %v297_v24 = vmul.f32 %v293_v17, %v214_v16 }
  0xcf   :  { %v268_v25 = vadd.f32 %v474_v3, %v267_v20  ;;  %348 = vmatmul.f32.vlgmr.msrb.gmra.mxu0 %v296_v22 }
  0xd0   :  { %v281_v28 = vmul.f32 %v476_v12, %v280_v23  ;;  %371 = vmatmul.f32.vlgmr.msrb.gmra.mxu1 %v297_v24 }
  0xd1   :  { %v272_v31 = vsel %vm271_vm10, %v474_v3, %v268_v25 }
  0xd2   :  { %v277_v29 = vsel %vm274_vm12, %v276_v27, %v272_v31  ;;  %v282_v32 = vadd.f32 %v476_v12, %v281_v28 }
  0xd3   :  { %v294_v34 = vmul.f32 %v277_v29, %v628_v40 }
  0xd4   :  { %v286_v36 = vsel %vm285_vm14, %v476_v12, %v282_v32 }
  0xd5   :  { %v291_v37 = vsel %vm288_vm15, %v290_v35, %v286_v36  ;;  %v298_v38 = vmul.f32 %v294_v34, %v194_v33 }
  0xd6   :  { %v295_v42 = vmul.f32 %v291_v37, %v630_v41 }
  0xd7   :  { %351 = vmatmul.f32.vlgmr.msrb.gmra.mxu2 %v298_v38 }
  0xd8   :  { %v299_v43 = vmul.f32 %v295_v42, %v217_v39 }
  0xda   :  { %374 = vmatmul.f32.vlgmr.msrb.gmra.mxu3 %v299_v43 }
 0x14c   :  { %v349_v44 = vpop.f32.mrf.mxu0 }
 0x14d   :  { %v372_v45 = vpop.f32.mrf.mxu1 }
 0x14e   :  { %v373_v46 = vadd.f32 %v372_v45, %v349_v44 }
 0x150   :  { %399 = vst [vmem:[#allocation9] sm:$0xff] %v373_v46 }
 0x15a   :  { %v352_v47 = vpop.f32.mrf.mxu2 }
 0x15d   :  { %v375_v40 = vpop.f32.mrf.mxu3 }
 0x15e   :  { %v376_v48 = vadd.f32 %v375_v40, %v352_v47 }
 0x160   :  { %400 = vst [vmem:[#allocation9 + $0x8] sm:$0xff] %v376_v48 }
 0x161   :  { %413 = dma.vmem_to_hbm [thread:$0]  %s406_s29, 256, %s408_s5, [#allocation5], %s583_s24, %s583_s24, %s584_s25  }
 0x162   :  { %577 = dma.done.wait [#allocation5], 256  }
 0x163   :  { %578 = vsyncadd [#allocation5], 4294967040 }
 0x164   :  { %418 = vsyncpa [#allocation4], 1 }
 0x165   :  { %419 = vsyncpa [#allocation7], 1 }
 0x166   :  { %420 = vsyncpa [#allocation5], 1 }

</bundles_post_ra>
